<compile_context>
chip_gen: v7x
topology: tpu7x:2x2x1
jax: 0.10.0
libtpu: 0.0.40
codegen_flags: <defaults>
</compile_context>

<pallas_src>
import functools

import jax
import jax.numpy as jnp
from jax.experimental import pallas as pl
from jax.experimental.pallas import tpu as pltpu

# ---------------- config (small, consistent with T5Attention/T5LayerNorm) ----
BATCH = 2
SEQ_Q = 8        # decoder (query) length
SEQ_KV = 16      # encoder (key/value) length
D_MODEL = 32
N_HEADS = 4
D_KV = 8         # key_value_proj_dim
INNER_DIM = N_HEADS * D_KV   # == 32
LN_EPS = 1e-6


# ---------------------------- Pallas kernel ----------------------------------
def _cross_attn_kernel(hid_ref, kv_ref, wqkv_ref, wo_ref, out_ref, *,
                       eps, n_heads, d_kv):
    # hid_ref : (B, Lq, D)   decoder hidden states
    # kv_ref  : (B, Lkv, D)  encoder hidden states
    # wqkv_ref: (D, 3*inner) = [ln-folded Wq^T | Wk^T | Wv^T]
    # wo_ref  : (inner, D)
    # out_ref : (B, Lq, D)
    B, Lq, D = hid_ref.shape
    _, Lkv, _ = kv_ref.shape
    inner = n_heads * d_kv

    x = hid_ref[...].astype(jnp.float32).reshape(B * Lq, D)     # (B*Lq, D)
    kv = kv_ref[...].astype(jnp.float32).reshape(B * Lkv, D)    # (B*Lkv, D)

    # --- T5LayerNorm (RMS norm; scale folded into Wq on the host) ---
    variance = jnp.mean(x * x, axis=-1, keepdims=True)
    normed = x * jax.lax.rsqrt(variance + eps)                  # (B*Lq, D)

    wqkv = wqkv_ref[...].astype(jnp.float32)                    # (D, 3*inner)
    wq = wqkv[:, :inner]                                        # (D, inner)
    wkv = wqkv[:, inner:]                                       # (D, 2*inner)

    # --- wide projections (two MXU pushes for all of Q, K, V) ---
    q_all = jnp.dot(normed, wq, preferred_element_type=jnp.float32)   # (B*Lq, inner)
    kv_all = jnp.dot(kv, wkv, preferred_element_type=jnp.float32)     # (B*Lkv, 2*inner)
    k_all = kv_all[:, :inner]
    v_all = kv_all[:, inner:]

    q3 = q_all.reshape(B, Lq, inner)
    k3 = k_all.reshape(B, Lkv, inner)
    v3 = v_all.reshape(B, Lkv, inner)

    # --- per-(batch, head) attention with static lane slices ---
    # position_bias is zeros for cross-attention, attention_mask=None,
    # and T5 uses unscaled dot-product attention.
    attn_rows = []
    for b in range(B):                                  # static loop, B=2
        head_outs = []
        for h in range(n_heads):                        # static loop, H=4
            lo, hi = h * d_kv, (h + 1) * d_kv
            q_bh = q3[b, :, lo:hi]                      # (Lq, d_kv)
            k_bh = k3[b, :, lo:hi]                      # (Lkv, d_kv)
            v_bh = v3[b, :, lo:hi]                      # (Lkv, d_kv)

            # scores: contract last dims (q . k^T) without explicit transpose.
            s = jax.lax.dot_general(
                q_bh, k_bh,
                dimension_numbers=(((1,), (1,)), ((), ())),
                preferred_element_type=jnp.float32)     # (Lq, Lkv)

            s = s - jnp.max(s, axis=-1, keepdims=True)
            p = jnp.exp(s)
            p = p / jnp.sum(p, axis=-1, keepdims=True)  # exact (1e-4 tolerance)

            head_outs.append(
                jnp.dot(p, v_bh, preferred_element_type=jnp.float32))  # (Lq, d_kv)
        attn_rows.append(jnp.concatenate(head_outs, axis=-1))          # (Lq, inner)
    attn = jnp.concatenate(attn_rows, axis=0)                          # (B*Lq, inner)

    # --- single wide output projection + residual ---
    proj = jnp.dot(attn, wo_ref[...].astype(jnp.float32),
                   preferred_element_type=jnp.float32)                 # (B*Lq, D)
    out_ref[...] = (x + proj).reshape(B, Lq, D).astype(out_ref.dtype)


# ---------------------------- wrapper -----------------------------------------
def t5_layer_cross_attention(hidden_states, key_value_states, params):
    """Returns (layer_output, present_key_value_state, position_bias),
    matching T5LayerCrossAttention.forward with use_cache=False, no mask."""
    B, Lq, D = hidden_states.shape
    _, Lkv, _ = key_value_states.shape
    inner = params["wq"].shape[0]
    n_heads = N_HEADS
    d_kv = inner // n_heads

    # --- host-side weight layout plumbing (no in-kernel transposes) ---
    # PyTorch Linear: y = x @ W.T with W: (out, in)  ->  pass W.T = (in, out).
    # RMS-norm scale feeds only the Q projection (K/V use encoder states,
    # residual uses raw x), so fold it into Wq^T exactly.
    wq_t = params["ln_weight"][:, None] * params["wq"].T   # (D, inner)
    wk_t = params["wk"].T                                   # (D, inner)
    wv_t = params["wv"].T                                   # (D, inner)
    w_qkv = jnp.concatenate([wq_t, wk_t, wv_t], axis=1)     # (D, 3*inner)
    w_o = params["wo"].T                                     # (inner, D)

    kernel = functools.partial(_cross_attn_kernel, eps=LN_EPS,
                               n_heads=n_heads, d_kv=d_kv)

    # --- advisory cost estimate so XLA schedules around this tiny call ---
    flops = (
        2 * (B * Lq) * D * inner            # Q projection
        + 2 * (B * Lkv) * D * (2 * inner)   # K and V projections
        + 2 * 2 * B * Lq * Lkv * inner      # scores + attn@V
        + 2 * (B * Lq) * inner * D          # output projection
    )
    transcendentals = B * n_heads * Lq * Lkv + B * Lq       # exp + rsqrt
    bytes_accessed = 4 * (2 * B * Lq * D + B * Lkv * D + 3 * D * inner + inner * D)
    cost = pl.CostEstimate(flops=flops, transcendentals=transcendentals,
                           bytes_accessed=bytes_accessed)

    vmem_spec = pl.BlockSpec(memory_space=pltpu.MemorySpace.VMEM)
    layer_output = pl.pallas_call(
        kernel,
        out_shape=jax.ShapeDtypeStruct((B, Lq, D), hidden_states.dtype),
        in_specs=[vmem_spec, vmem_spec, vmem_spec, vmem_spec],
        out_specs=vmem_spec,
        cost_estimate=cost,
    )(hidden_states, key_value_states, w_qkv, w_o)

    # Cross attention has has_relative_attention_bias=False -> bias is zeros.
    position_bias = jnp.zeros((1, n_heads, Lq, Lkv), hidden_states.dtype)
    present_key_value_state = None   # use_cache=False, non-caching path
    # TODO(synk): dropout omitted (identity in eval mode); past_key_value /
    # use_cache caching path not implemented.
    return layer_output, present_key_value_state, position_bias


# ---------------------------- pure-JAX reference -------------------------------
def _reference(hidden_states, key_value_states, params):
    x = hidden_states.astype(jnp.float32)
    kv = key_value_states.astype(jnp.float32)
    var = jnp.mean(x * x, axis=-1, keepdims=True)
    normed = x * jax.lax.rsqrt(var + LN_EPS) * params["ln_weight"]
    q = normed @ params["wq"].T
    k = kv @ params["wk"].T
    v = kv @ params["wv"].T
    B, Lq, _ = q.shape
    Lkv = k.shape[1]
    q = q.reshape(B, Lq, N_HEADS, D_KV).transpose(0, 2, 1, 3)
    k = k.reshape(B, Lkv, N_HEADS, D_KV).transpose(0, 2, 1, 3)
    v = v.reshape(B, Lkv, N_HEADS, D_KV).transpose(0, 2, 1, 3)
    scores = jnp.einsum("bhqd,bhkd->bhqk", q, k)
    w = jax.nn.softmax(scores, axis=-1)
    attn = jnp.einsum("bhqk,bhkd->bhqd", w, v)
    attn = attn.transpose(0, 2, 1, 3).reshape(B, Lq, INNER_DIM)
    attn = attn @ params["wo"].T
    return hidden_states + attn


# ---------------------------- main ---------------------------------------------
if __name__ == "__main__":
    key = jax.random.PRNGKey(0)
    k_hid, k_kv, k_q, k_k, k_v, k_o = jax.random.split(key, 6)

    hidden_states = jax.random.normal(k_hid, (BATCH, SEQ_Q, D_MODEL), jnp.float32)
    key_value_states = jax.random.normal(k_kv, (BATCH, SEQ_KV, D_MODEL), jnp.float32)

    params = {
        "ln_weight": jnp.ones((D_MODEL,), jnp.float32),
        "wq": 0.05 * jax.random.normal(k_q, (INNER_DIM, D_MODEL), jnp.float32),
        "wk": 0.05 * jax.random.normal(k_k, (INNER_DIM, D_MODEL), jnp.float32),
        "wv": 0.05 * jax.random.normal(k_v, (INNER_DIM, D_MODEL), jnp.float32),
        "wo": 0.05 * jax.random.normal(k_o, (D_MODEL, INNER_DIM), jnp.float32),
    }

    layer_output, present_kv, position_bias = t5_layer_cross_attention(
        hidden_states, key_value_states, params)
    layer_output = jax.block_until_ready(layer_output)

    ref = _reference(hidden_states, key_value_states, params)
    assert layer_output.shape == (BATCH, SEQ_Q, D_MODEL)
    assert position_bias.shape == (1, N_HEADS, SEQ_Q, SEQ_KV)
    assert jnp.allclose(layer_output, ref, atol=1e-4, rtol=1e-4)

    print("KERNEL_OK")
</pallas_src>

<mosaic_0001>
module attributes {stable_mosaic.version = 11 : i64} {
  func.func @_cross_attn_kernel(%arg0: memref<2x8x32xf32, #tpu.memory_space<vmem>>, %arg1: memref<2x16x32xf32, #tpu.memory_space<vmem>>, %arg2: memref<32x96xf32, #tpu.memory_space<vmem>>, %arg3: memref<32x32xf32, #tpu.memory_space<vmem>>, %arg4: memref<2x8x32xf32, #tpu.memory_space<vmem>>) attributes {dimension_semantics = [], scalar_prefetch = 0 : i64, scratch_operands = 0 : i64, tpu.core_type = #tpu.core_type<tc>} {
    %c0 = arith.constant 0 : index
    %c0_0 = arith.constant 0 : index
    %c0_1 = arith.constant 0 : index
    %0 = vector.load %arg0[%c0, %c0_0, %c0_1] : memref<2x8x32xf32, #tpu.memory_space<vmem>>, vector<2x8x32xf32>
    %1 = vector.shape_cast %0 : vector<2x8x32xf32> to vector<16x32xf32>
    %c0_2 = arith.constant 0 : index
    %c0_3 = arith.constant 0 : index
    %c0_4 = arith.constant 0 : index
    %2 = vector.load %arg1[%c0_2, %c0_3, %c0_4] : memref<2x16x32xf32, #tpu.memory_space<vmem>>, vector<2x16x32xf32>
    %3 = vector.shape_cast %2 : vector<2x16x32xf32> to vector<32x32xf32>
    %4 = arith.mulf %1, %1 : vector<16x32xf32>
    %cst = arith.constant dense<0.000000e+00> : vector<16xf32>
    %5 = vector.multi_reduction <add>, %4, %cst [1] : vector<16x32xf32> to vector<16xf32>
    %6 = vector.shape_cast %5 : vector<16xf32> to vector<16x1xf32>
    %cst_5 = arith.constant 3.200000e+01 : f32
    %7 = vector.broadcast %cst_5 : f32 to vector<16x1xf32>
    %8 = arith.divf %6, %7 : vector<16x1xf32>
    %cst_6 = arith.constant 9.99999997E-7 : f32
    %9 = vector.broadcast %cst_6 : f32 to vector<16x1xf32>
    %10 = arith.addf %8, %9 : vector<16x1xf32>
    %11 = math.rsqrt %10 : vector<16x1xf32>
    %12 = vector.broadcast %11 : vector<16x1xf32> to vector<16x32xf32>
    %13 = arith.mulf %1, %12 : vector<16x32xf32>
    %c0_7 = arith.constant 0 : index
    %c0_8 = arith.constant 0 : index
    %14 = vector.load %arg2[%c0_7, %c0_8] : memref<32x96xf32, #tpu.memory_space<vmem>>, vector<32x96xf32>
    %15 = vector.extract_strided_slice %14 {offsets = [0, 0], sizes = [32, 32], strides = [1, 1]} : vector<32x96xf32> to vector<32x32xf32>
    %16 = vector.extract_strided_slice %14 {offsets = [0, 32], sizes = [32, 64], strides = [1, 1]} : vector<32x96xf32> to vector<32x64xf32>
    %cst_9 = arith.constant dense<0.000000e+00> : vector<16x32xf32>
    %17 = tpu.matmul %13, %15, %cst_9 {dimension_numbers = #tpu.dot_dimension_numbers<[1], [0], [0], [1], [0, 0, 1, 1], [], []>} : vector<16x32xf32>, vector<32x32xf32>, vector<16x32xf32> -> vector<16x32xf32>
    %cst_10 = arith.constant dense<0.000000e+00> : vector<32x64xf32>
    %18 = tpu.matmul %3, %16, %cst_10 {dimension_numbers = #tpu.dot_dimension_numbers<[1], [0], [0], [1], [0, 0, 1, 1], [], []>} : vector<32x32xf32>, vector<32x64xf32>, vector<32x64xf32> -> vector<32x64xf32>
    %19 = vector.extract_strided_slice %18 {offsets = [0, 0], sizes = [32, 32], strides = [1, 1]} : vector<32x64xf32> to vector<32x32xf32>
    %20 = vector.extract_strided_slice %18 {offsets = [0, 32], sizes = [32, 32], strides = [1, 1]} : vector<32x64xf32> to vector<32x32xf32>
    %21 = vector.shape_cast %17 : vector<16x32xf32> to vector<2x8x32xf32>
    %22 = vector.shape_cast %19 : vector<32x32xf32> to vector<2x16x32xf32>
    %23 = vector.shape_cast %20 : vector<32x32xf32> to vector<2x16x32xf32>
    %24 = vector.extract_strided_slice %21 {offsets = [0, 0, 0], sizes = [1, 8, 8], strides = [1, 1, 1]} : vector<2x8x32xf32> to vector<1x8x8xf32>
    %25 = vector.shape_cast %24 : vector<1x8x8xf32> to vector<8x8xf32>
    %26 = vector.extract_strided_slice %22 {offsets = [0, 0, 0], sizes = [1, 16, 8], strides = [1, 1, 1]} : vector<2x16x32xf32> to vector<1x16x8xf32>
    %27 = vector.shape_cast %26 : vector<1x16x8xf32> to vector<16x8xf32>
    %28 = vector.extract_strided_slice %23 {offsets = [0, 0, 0], sizes = [1, 16, 8], strides = [1, 1, 1]} : vector<2x16x32xf32> to vector<1x16x8xf32>
    %29 = vector.shape_cast %28 : vector<1x16x8xf32> to vector<16x8xf32>
    %cst_11 = arith.constant dense<0.000000e+00> : vector<8x16xf32>
    %30 = tpu.matmul %25, %27, %cst_11 {dimension_numbers = #tpu.dot_dimension_numbers<[1], [1], [0], [0], [0, 0, 1, 0], [], []>} : vector<8x8xf32>, vector<16x8xf32>, vector<8x16xf32> -> vector<8x16xf32>
    %cst_12 = arith.constant dense<0xFF800000> : vector<8xf32>
    %31 = vector.multi_reduction <maximumf>, %30, %cst_12 [1] : vector<8x16xf32> to vector<8xf32>
    %32 = vector.shape_cast %31 : vector<8xf32> to vector<8x1xf32>
    %33 = vector.broadcast %32 : vector<8x1xf32> to vector<8x16xf32>
    %34 = arith.subf %30, %33 : vector<8x16xf32>
    %35 = math.exp %34 : vector<8x16xf32>
    %cst_13 = arith.constant dense<0.000000e+00> : vector<8xf32>
    %36 = vector.multi_reduction <add>, %35, %cst_13 [1] : vector<8x16xf32> to vector<8xf32>
    %37 = vector.shape_cast %36 : vector<8xf32> to vector<8x1xf32>
    %38 = vector.broadcast %37 : vector<8x1xf32> to vector<8x16xf32>
    %39 = arith.divf %35, %38 : vector<8x16xf32>
    %cst_14 = arith.constant dense<0.000000e+00> : vector<8x8xf32>
    %40 = tpu.matmul %39, %29, %cst_14 {dimension_numbers = #tpu.dot_dimension_numbers<[1], [0], [0], [1], [0, 0, 1, 1], [], []>} : vector<8x16xf32>, vector<16x8xf32>, vector<8x8xf32> -> vector<8x8xf32>
    %41 = vector.extract_strided_slice %21 {offsets = [0, 0, 8], sizes = [1, 8, 8], strides = [1, 1, 1]} : vector<2x8x32xf32> to vector<1x8x8xf32>
    %42 = vector.shape_cast %41 : vector<1x8x8xf32> to vector<8x8xf32>
    %43 = vector.extract_strided_slice %22 {offsets = [0, 0, 8], sizes = [1, 16, 8], strides = [1, 1, 1]} : vector<2x16x32xf32> to vector<1x16x8xf32>
    %44 = vector.shape_cast %43 : vector<1x16x8xf32> to vector<16x8xf32>
    %45 = vector.extract_strided_slice %23 {offsets = [0, 0, 8], sizes = [1, 16, 8], strides = [1, 1, 1]} : vector<2x16x32xf32> to vector<1x16x8xf32>
    %46 = vector.shape_cast %45 : vector<1x16x8xf32> to vector<16x8xf32>
    %cst_15 = arith.constant dense<0.000000e+00> : vector<8x16xf32>
    %47 = tpu.matmul %42, %44, %cst_15 {dimension_numbers = #tpu.dot_dimension_numbers<[1], [1], [0], [0], [0, 0, 1, 0], [], []>} : vector<8x8xf32>, vector<16x8xf32>, vector<8x16xf32> -> vector<8x16xf32>
    %cst_16 = arith.constant dense<0xFF800000> : vector<8xf32>
    %48 = vector.multi_reduction <maximumf>, %47, %cst_16 [1] : vector<8x16xf32> to vector<8xf32>
    %49 = vector.shape_cast %48 : vector<8xf32> to vector<8x1xf32>
    %50 = vector.broadcast %49 : vector<8x1xf32> to vector<8x16xf32>
    %51 = arith.subf %47, %50 : vector<8x16xf32>
    %52 = math.exp %51 : vector<8x16xf32>
    %cst_17 = arith.constant dense<0.000000e+00> : vector<8xf32>
    %53 = vector.multi_reduction <add>, %52, %cst_17 [1] : vector<8x16xf32> to vector<8xf32>
    %54 = vector.shape_cast %53 : vector<8xf32> to vector<8x1xf32>
    %55 = vector.broadcast %54 : vector<8x1xf32> to vector<8x16xf32>
    %56 = arith.divf %52, %55 : vector<8x16xf32>
    %cst_18 = arith.constant dense<0.000000e+00> : vector<8x8xf32>
    %57 = tpu.matmul %56, %46, %cst_18 {dimension_numbers = #tpu.dot_dimension_numbers<[1], [0], [0], [1], [0, 0, 1, 1], [], []>} : vector<8x16xf32>, vector<16x8xf32>, vector<8x8xf32> -> vector<8x8xf32>
    %58 = vector.extract_strided_slice %21 {offsets = [0, 0, 16], sizes = [1, 8, 8], strides = [1, 1, 1]} : vector<2x8x32xf32> to vector<1x8x8xf32>
    %59 = vector.shape_cast %58 : vector<1x8x8xf32> to vector<8x8xf32>
    %60 = vector.extract_strided_slice %22 {offsets = [0, 0, 16], sizes = [1, 16, 8], strides = [1, 1, 1]} : vector<2x16x32xf32> to vector<1x16x8xf32>
    %61 = vector.shape_cast %60 : vector<1x16x8xf32> to vector<16x8xf32>
    %62 = vector.extract_strided_slice %23 {offsets = [0, 0, 16], sizes = [1, 16, 8], strides = [1, 1, 1]} : vector<2x16x32xf32> to vector<1x16x8xf32>
    %63 = vector.shape_cast %62 : vector<1x16x8xf32> to vector<16x8xf32>
    %cst_19 = arith.constant dense<0.000000e+00> : vector<8x16xf32>
    %64 = tpu.matmul %59, %61, %cst_19 {dimension_numbers = #tpu.dot_dimension_numbers<[1], [1], [0], [0], [0, 0, 1, 0], [], []>} : vector<8x8xf32>, vector<16x8xf32>, vector<8x16xf32> -> vector<8x16xf32>
    %cst_20 = arith.constant dense<0xFF800000> : vector<8xf32>
    %65 = vector.multi_reduction <maximumf>, %64, %cst_20 [1] : vector<8x16xf32> to vector<8xf32>
    %66 = vector.shape_cast %65 : vector<8xf32> to vector<8x1xf32>
    %67 = vector.broadcast %66 : vector<8x1xf32> to vector<8x16xf32>
    %68 = arith.subf %64, %67 : vector<8x16xf32>
    %69 = math.exp %68 : vector<8x16xf32>
    %cst_21 = arith.constant dense<0.000000e+00> : vector<8xf32>
    %70 = vector.multi_reduction <add>, %69, %cst_21 [1] : vector<8x16xf32> to vector<8xf32>
    %71 = vector.shape_cast %70 : vector<8xf32> to vector<8x1xf32>
    %72 = vector.broadcast %71 : vector<8x1xf32> to vector<8x16xf32>
    %73 = arith.divf %69, %72 : vector<8x16xf32>
    %cst_22 = arith.constant dense<0.000000e+00> : vector<8x8xf32>
    %74 = tpu.matmul %73, %63, %cst_22 {dimension_numbers = #tpu.dot_dimension_numbers<[1], [0], [0], [1], [0, 0, 1, 1], [], []>} : vector<8x16xf32>, vector<16x8xf32>, vector<8x8xf32> -> vector<8x8xf32>
    %75 = vector.extract_strided_slice %21 {offsets = [0, 0, 24], sizes = [1, 8, 8], strides = [1, 1, 1]} : vector<2x8x32xf32> to vector<1x8x8xf32>
    %76 = vector.shape_cast %75 : vector<1x8x8xf32> to vector<8x8xf32>
    %77 = vector.extract_strided_slice %22 {offsets = [0, 0, 24], sizes = [1, 16, 8], strides = [1, 1, 1]} : vector<2x16x32xf32> to vector<1x16x8xf32>
    %78 = vector.shape_cast %77 : vector<1x16x8xf32> to vector<16x8xf32>
    %79 = vector.extract_strided_slice %23 {offsets = [0, 0, 24], sizes = [1, 16, 8], strides = [1, 1, 1]} : vector<2x16x32xf32> to vector<1x16x8xf32>
    %80 = vector.shape_cast %79 : vector<1x16x8xf32> to vector<16x8xf32>
    %cst_23 = arith.constant dense<0.000000e+00> : vector<8x16xf32>
    %81 = tpu.matmul %76, %78, %cst_23 {dimension_numbers = #tpu.dot_dimension_numbers<[1], [1], [0], [0], [0, 0, 1, 0], [], []>} : vector<8x8xf32>, vector<16x8xf32>, vector<8x16xf32> -> vector<8x16xf32>
    %cst_24 = arith.constant dense<0xFF800000> : vector<8xf32>
    %82 = vector.multi_reduction <maximumf>, %81, %cst_24 [1] : vector<8x16xf32> to vector<8xf32>
    %83 = vector.shape_cast %82 : vector<8xf32> to vector<8x1xf32>
    %84 = vector.broadcast %83 : vector<8x1xf32> to vector<8x16xf32>
    %85 = arith.subf %81, %84 : vector<8x16xf32>
    %86 = math.exp %85 : vector<8x16xf32>
    %cst_25 = arith.constant dense<0.000000e+00> : vector<8xf32>
    %87 = vector.multi_reduction <add>, %86, %cst_25 [1] : vector<8x16xf32> to vector<8xf32>
    %88 = vector.shape_cast %87 : vector<8xf32> to vector<8x1xf32>
    %89 = vector.broadcast %88 : vector<8x1xf32> to vector<8x16xf32>
    %90 = arith.divf %86, %89 : vector<8x16xf32>
    %cst_26 = arith.constant dense<0.000000e+00> : vector<8x8xf32>
    %91 = tpu.matmul %90, %80, %cst_26 {dimension_numbers = #tpu.dot_dimension_numbers<[1], [0], [0], [1], [0, 0, 1, 1], [], []>} : vector<8x16xf32>, vector<16x8xf32>, vector<8x8xf32> -> vector<8x8xf32>
    %92 = tpu.concatenate %40, %57, %74, %91 in 1 : vector<8x8xf32>, vector<8x8xf32>, vector<8x8xf32>, vector<8x8xf32> -> vector<8x32xf32>
    %93 = vector.extract_strided_slice %21 {offsets = [1, 0, 0], sizes = [1, 8, 8], strides = [1, 1, 1]} : vector<2x8x32xf32> to vector<1x8x8xf32>
    %94 = vector.shape_cast %93 : vector<1x8x8xf32> to vector<8x8xf32>
    %95 = vector.extract_strided_slice %22 {offsets = [1, 0, 0], sizes = [1, 16, 8], strides = [1, 1, 1]} : vector<2x16x32xf32> to vector<1x16x8xf32>
    %96 = vector.shape_cast %95 : vector<1x16x8xf32> to vector<16x8xf32>
    %97 = vector.extract_strided_slice %23 {offsets = [1, 0, 0], sizes = [1, 16, 8], strides = [1, 1, 1]} : vector<2x16x32xf32> to vector<1x16x8xf32>
    %98 = vector.shape_cast %97 : vector<1x16x8xf32> to vector<16x8xf32>
    %cst_27 = arith.constant dense<0.000000e+00> : vector<8x16xf32>
    %99 = tpu.matmul %94, %96, %cst_27 {dimension_numbers = #tpu.dot_dimension_numbers<[1], [1], [0], [0], [0, 0, 1, 0], [], []>} : vector<8x8xf32>, vector<16x8xf32>, vector<8x16xf32> -> vector<8x16xf32>
    %cst_28 = arith.constant dense<0xFF800000> : vector<8xf32>
    %100 = vector.multi_reduction <maximumf>, %99, %cst_28 [1] : vector<8x16xf32> to vector<8xf32>
    %101 = vector.shape_cast %100 : vector<8xf32> to vector<8x1xf32>
    %102 = vector.broadcast %101 : vector<8x1xf32> to vector<8x16xf32>
    %103 = arith.subf %99, %102 : vector<8x16xf32>
    %104 = math.exp %103 : vector<8x16xf32>
    %cst_29 = arith.constant dense<0.000000e+00> : vector<8xf32>
    %105 = vector.multi_reduction <add>, %104, %cst_29 [1] : vector<8x16xf32> to vector<8xf32>
    %106 = vector.shape_cast %105 : vector<8xf32> to vector<8x1xf32>
    %107 = vector.broadcast %106 : vector<8x1xf32> to vector<8x16xf32>
    %108 = arith.divf %104, %107 : vector<8x16xf32>
    %cst_30 = arith.constant dense<0.000000e+00> : vector<8x8xf32>
    %109 = tpu.matmul %108, %98, %cst_30 {dimension_numbers = #tpu.dot_dimension_numbers<[1], [0], [0], [1], [0, 0, 1, 1], [], []>} : vector<8x16xf32>, vector<16x8xf32>, vector<8x8xf32> -> vector<8x8xf32>
    %110 = vector.extract_strided_slice %21 {offsets = [1, 0, 8], sizes = [1, 8, 8], strides = [1, 1, 1]} : vector<2x8x32xf32> to vector<1x8x8xf32>
    %111 = vector.shape_cast %110 : vector<1x8x8xf32> to vector<8x8xf32>
    %112 = vector.extract_strided_slice %22 {offsets = [1, 0, 8], sizes = [1, 16, 8], strides = [1, 1, 1]} : vector<2x16x32xf32> to vector<1x16x8xf32>
    %113 = vector.shape_cast %112 : vector<1x16x8xf32> to vector<16x8xf32>
    %114 = vector.extract_strided_slice %23 {offsets = [1, 0, 8], sizes = [1, 16, 8], strides = [1, 1, 1]} : vector<2x16x32xf32> to vector<1x16x8xf32>
    %115 = vector.shape_cast %114 : vector<1x16x8xf32> to vector<16x8xf32>
    %cst_31 = arith.constant dense<0.000000e+00> : vector<8x16xf32>
    %116 = tpu.matmul %111, %113, %cst_31 {dimension_numbers = #tpu.dot_dimension_numbers<[1], [1], [0], [0], [0, 0, 1, 0], [], []>} : vector<8x8xf32>, vector<16x8xf32>, vector<8x16xf32> -> vector<8x16xf32>
    %cst_32 = arith.constant dense<0xFF800000> : vector<8xf32>
    %117 = vector.multi_reduction <maximumf>, %116, %cst_32 [1] : vector<8x16xf32> to vector<8xf32>
    %118 = vector.shape_cast %117 : vector<8xf32> to vector<8x1xf32>
    %119 = vector.broadcast %118 : vector<8x1xf32> to vector<8x16xf32>
    %120 = arith.subf %116, %119 : vector<8x16xf32>
    %121 = math.exp %120 : vector<8x16xf32>
    %cst_33 = arith.constant dense<0.000000e+00> : vector<8xf32>
    %122 = vector.multi_reduction <add>, %121, %cst_33 [1] : vector<8x16xf32> to vector<8xf32>
    %123 = vector.shape_cast %122 : vector<8xf32> to vector<8x1xf32>
    %124 = vector.broadcast %123 : vector<8x1xf32> to vector<8x16xf32>
    %125 = arith.divf %121, %124 : vector<8x16xf32>
    %cst_34 = arith.constant dense<0.000000e+00> : vector<8x8xf32>
    %126 = tpu.matmul %125, %115, %cst_34 {dimension_numbers = #tpu.dot_dimension_numbers<[1], [0], [0], [1], [0, 0, 1, 1], [], []>} : vector<8x16xf32>, vector<16x8xf32>, vector<8x8xf32> -> vector<8x8xf32>
    %127 = vector.extract_strided_slice %21 {offsets = [1, 0, 16], sizes = [1, 8, 8], strides = [1, 1, 1]} : vector<2x8x32xf32> to vector<1x8x8xf32>
    %128 = vector.shape_cast %127 : vector<1x8x8xf32> to vector<8x8xf32>
    %129 = vector.extract_strided_slice %22 {offsets = [1, 0, 16], sizes = [1, 16, 8], strides = [1, 1, 1]} : vector<2x16x32xf32> to vector<1x16x8xf32>
    %130 = vector.shape_cast %129 : vector<1x16x8xf32> to vector<16x8xf32>
    %131 = vector.extract_strided_slice %23 {offsets = [1, 0, 16], sizes = [1, 16, 8], strides = [1, 1, 1]} : vector<2x16x32xf32> to vector<1x16x8xf32>
    %132 = vector.shape_cast %131 : vector<1x16x8xf32> to vector<16x8xf32>
    %cst_35 = arith.constant dense<0.000000e+00> : vector<8x16xf32>
    %133 = tpu.matmul %128, %130, %cst_35 {dimension_numbers = #tpu.dot_dimension_numbers<[1], [1], [0], [0], [0, 0, 1, 0], [], []>} : vector<8x8xf32>, vector<16x8xf32>, vector<8x16xf32> -> vector<8x16xf32>
    %cst_36 = arith.constant dense<0xFF800000> : vector<8xf32>
    %134 = vector.multi_reduction <maximumf>, %133, %cst_36 [1] : vector<8x16xf32> to vector<8xf32>
    %135 = vector.shape_cast %134 : vector<8xf32> to vector<8x1xf32>
    %136 = vector.broadcast %135 : vector<8x1xf32> to vector<8x16xf32>
    %137 = arith.subf %133, %136 : vector<8x16xf32>
    %138 = math.exp %137 : vector<8x16xf32>
    %cst_37 = arith.constant dense<0.000000e+00> : vector<8xf32>
    %139 = vector.multi_reduction <add>, %138, %cst_37 [1] : vector<8x16xf32> to vector<8xf32>
    %140 = vector.shape_cast %139 : vector<8xf32> to vector<8x1xf32>
    %141 = vector.broadcast %140 : vector<8x1xf32> to vector<8x16xf32>
    %142 = arith.divf %138, %141 : vector<8x16xf32>
    %cst_38 = arith.constant dense<0.000000e+00> : vector<8x8xf32>
    %143 = tpu.matmul %142, %132, %cst_38 {dimension_numbers = #tpu.dot_dimension_numbers<[1], [0], [0], [1], [0, 0, 1, 1], [], []>} : vector<8x16xf32>, vector<16x8xf32>, vector<8x8xf32> -> vector<8x8xf32>
    %144 = vector.extract_strided_slice %21 {offsets = [1, 0, 24], sizes = [1, 8, 8], strides = [1, 1, 1]} : vector<2x8x32xf32> to vector<1x8x8xf32>
    %145 = vector.shape_cast %144 : vector<1x8x8xf32> to vector<8x8xf32>
    %146 = vector.extract_strided_slice %22 {offsets = [1, 0, 24], sizes = [1, 16, 8], strides = [1, 1, 1]} : vector<2x16x32xf32> to vector<1x16x8xf32>
    %147 = vector.shape_cast %146 : vector<1x16x8xf32> to vector<16x8xf32>
    %148 = vector.extract_strided_slice %23 {offsets = [1, 0, 24], sizes = [1, 16, 8], strides = [1, 1, 1]} : vector<2x16x32xf32> to vector<1x16x8xf32>
    %149 = vector.shape_cast %148 : vector<1x16x8xf32> to vector<16x8xf32>
    %cst_39 = arith.constant dense<0.000000e+00> : vector<8x16xf32>
    %150 = tpu.matmul %145, %147, %cst_39 {dimension_numbers = #tpu.dot_dimension_numbers<[1], [1], [0], [0], [0, 0, 1, 0], [], []>} : vector<8x8xf32>, vector<16x8xf32>, vector<8x16xf32> -> vector<8x16xf32>
    %cst_40 = arith.constant dense<0xFF800000> : vector<8xf32>
    %151 = vector.multi_reduction <maximumf>, %150, %cst_40 [1] : vector<8x16xf32> to vector<8xf32>
    %152 = vector.shape_cast %151 : vector<8xf32> to vector<8x1xf32>
    %153 = vector.broadcast %152 : vector<8x1xf32> to vector<8x16xf32>
    %154 = arith.subf %150, %153 : vector<8x16xf32>
    %155 = math.exp %154 : vector<8x16xf32>
    %cst_41 = arith.constant dense<0.000000e+00> : vector<8xf32>
    %156 = vector.multi_reduction <add>, %155, %cst_41 [1] : vector<8x16xf32> to vector<8xf32>
    %157 = vector.shape_cast %156 : vector<8xf32> to vector<8x1xf32>
    %158 = vector.broadcast %157 : vector<8x1xf32> to vector<8x16xf32>
    %159 = arith.divf %155, %158 : vector<8x16xf32>
    %cst_42 = arith.constant dense<0.000000e+00> : vector<8x8xf32>
    %160 = tpu.matmul %159, %149, %cst_42 {dimension_numbers = #tpu.dot_dimension_numbers<[1], [0], [0], [1], [0, 0, 1, 1], [], []>} : vector<8x16xf32>, vector<16x8xf32>, vector<8x8xf32> -> vector<8x8xf32>
    %161 = tpu.concatenate %109, %126, %143, %160 in 1 : vector<8x8xf32>, vector<8x8xf32>, vector<8x8xf32>, vector<8x8xf32> -> vector<8x32xf32>
    %162 = tpu.concatenate %92, %161 in 0 : vector<8x32xf32>, vector<8x32xf32> -> vector<16x32xf32>
    %c0_43 = arith.constant 0 : index
    %c0_44 = arith.constant 0 : index
    %163 = vector.load %arg3[%c0_43, %c0_44] : memref<32x32xf32, #tpu.memory_space<vmem>>, vector<32x32xf32>
    %cst_45 = arith.constant dense<0.000000e+00> : vector<16x32xf32>
    %164 = tpu.matmul %162, %163, %cst_45 {dimension_numbers = #tpu.dot_dimension_numbers<[1], [0], [0], [1], [0, 0, 1, 1], [], []>} : vector<16x32xf32>, vector<32x32xf32>, vector<16x32xf32> -> vector<16x32xf32>
    %165 = arith.addf %1, %164 : vector<16x32xf32>
    %166 = vector.shape_cast %165 : vector<16x32xf32> to vector<2x8x32xf32>
    %c0_46 = arith.constant 0 : index
    %c0_47 = arith.constant 0 : index
    %c0_48 = arith.constant 0 : index
    %167 = vector.load %arg4[%c0_46, %c0_47, %c0_48] : memref<2x8x32xf32, #tpu.memory_space<vmem>>, vector<2x8x32xf32>
    tpu.vector_store %arg4[%c0_46, %c0_47, %c0_48], %166 {strides = array<i32>} : memref<2x8x32xf32, #tpu.memory_space<vmem>>, vector<2x8x32xf32>,
    return
  }
}

</mosaic_0001>

<bundles_post_ra>
// kernel: tpu_custom_call.1
= control target key start
LH: loop header
LB: loop body
LE: loop exit
PB: predicated region body
PF: predicated region fallthrough
CT: control target
= control target key end

     0   :  { %9 = vsyncpa [#allocation3], 0  ;;  %s2742_s0 = inlined_call_operand.hbm [shape: f32[2,8,32], index: 0, kind: input, shape index: {}]   ;;  %s2743_s1 = inlined_call_operand.hbm [shape: f32[2,16,32], index: 1, kind: input, shape index: {}]   ;;  %s2744_s2 = inlined_call_operand.hbm [shape: f32[32,96], index: 2, kind: input, shape index: {}]   ;;  %s2745_s3 = inlined_call_operand.hbm [shape: f32[32,32], index: 3, kind: input, shape index: {}]   ;;  %s2746_s4 = inlined_call_operand.hbm [shape: f32[2,8,32], index: 4, kind: output, shape index: {}]  }
   0x1   :  { %10 = vsyncpa [#allocation6], 0 }
   0x2   :  { %11 = vsyncpa [#allocation9], 0 }
   0x3   :  { %12 = vsyncpa [#allocation4], 0  ;;  %s2395_s15 = smov [#allocation5]   ;;  %s2396_s17 = smov [#allocation2]  }
   0x4   :  { %s30_s16 = sshll.u32 %s2395_s15, 4  ;;  %s18_s18 = sshll.u32 %s2396_s17, 4  ;;  %s31_s16 = int_to_ptr.vmem [resolvable:$true] %s30_s16  ;;  %s2439_s18 = int_to_ptr.vmem [resolvable:$true] %s18_s18 }
   0x5   :  { %s2277_s21 = scalar_lea.hbm %s2743_s1, 512 }
   0x6   :  { %p2278_p0 = scmp.ne.s32.totalorder %s2743_s1, %s2277_s21  ;;  %p2281_p1 = scmp.lt.u32.totalorder %s2277_s21, %s2743_s1 }
   0x8   :  { %p2283_p2 = pnand %p2281_p1, %p2278_p0 }
   0xa   :  { %2286 = shalt.err (!%p2283_p2)
}
   0xb   :  { %s2287_s26 = scalar_lea.vmem %s31_s16, 512  ;;  %p2292_p4 = scmp.lt.s32.totalorder %s31_s16, %s31_s16 }
   0xc   :  { %p2288_p3 = scmp.ne.s32.totalorder %s31_s16, %s2287_s26  ;;  %p2293_p5 = scmp.lt.s32.totalorder %s2287_s26, %s2287_s26 }
   0xe   :  { %p2294_p6 = por %p2293_p5, %p2292_p4 }
  0x10   :  { %p2295_p7 = pnand %p2294_p6, %p2288_p3 }
  0x12   :  { %2298 = shalt.err (!%p2295_p7)
}
  0x13   :  { %s2397_s27 = smov 128   ;;  %s2398_s28 = smov 8  }
  0x14   :  { %36 = dma.hbm_to_vmem [thread:$0]  %s2743_s1, 512, %s31_s16, [#allocation6], %s2397_s27, %s2397_s27, %s2398_s28  }
  0x15   :  { %s2299_s7 = scalar_lea.hbm %s2742_s0, 256 }
  0x16   :  { %p2300_p8 = scmp.ne.s32.totalorder %s2742_s0, %s2299_s7  ;;  %p2303_p9 = scmp.lt.u32.totalorder %s2299_s7, %s2742_s0 }
  0x18   :  { %p2305_p10 = pnand %p2303_p9, %p2300_p8 }
  0x1a   :  { %2308 = shalt.err (!%p2305_p10)
}
  0x1b   :  { %s2309_s12 = scalar_lea.vmem %s2439_s18, 256  ;;  %p2314_p12 = scmp.lt.s32.totalorder %s2439_s18, %s2439_s18 }
  0x1c   :  { %p2310_p11 = scmp.ne.s32.totalorder %s2439_s18, %s2309_s12  ;;  %p2315_p13 = scmp.lt.s32.totalorder %s2309_s12, %s2309_s12 }
  0x1e   :  { %p2316_p0 = por %p2315_p13, %p2314_p12 }
  0x20   :  { %p2317_p1 = pnand %p2316_p0, %p2310_p11 }
  0x22   :  { %2320 = shalt.err (!%p2317_p1)
}
  0x23   :  { %24 = dma.hbm_to_vmem [thread:$0]  %s2742_s0, 256, %s2439_s18, [#allocation3], %s2397_s27, %s2397_s27, %s2398_s28  }
  0x24   :  { %s2399_s14 = smov [#allocation7]   ;;  %s2400_s16 = smov [#allocation8]  }
  0x25   :  { %s42_s15 = sshll.u32 %s2399_s14, 4  ;;  %s54_s17 = sshll.u32 %s2400_s16, 4  ;;  %s43_s15 = int_to_ptr.vmem [resolvable:$true] %s42_s15  ;;  %s2476_s17 = int_to_ptr.vmem [resolvable:$true] %s54_s17 }
  0x26   :  { %s2321_s21 = scalar_lea.hbm %s2744_s2, 512 }
  0x27   :  { %p2322_p2 = scmp.ne.s32.totalorder %s2744_s2, %s2321_s21  ;;  %p2325_p3 = scmp.lt.u32.totalorder %s2321_s21, %s2744_s2 }
  0x29   :  { %p2327_p4 = pnand %p2325_p3, %p2322_p2 }
  0x2b   :  { %2330 = shalt.err (!%p2327_p4)
}
  0x2c   :  { %s2331_s0 = scalar_lea.vmem %s43_s15, 512  ;;  %p2336_p6 = scmp.lt.s32.totalorder %s43_s15, %s43_s15 }
  0x2d   :  { %p2332_p5 = scmp.ne.s32.totalorder %s43_s15, %s2331_s0  ;;  %p2337_p7 = scmp.lt.s32.totalorder %s2331_s0, %s2331_s0 }
  0x2f   :  { %p2338_p8 = por %p2337_p7, %p2336_p6 }
  0x31   :  { %p2339_p9 = pnand %p2338_p8, %p2332_p5 }
  0x33   :  { %2342 = shalt.err (!%p2339_p9)
}
  0x34   :  { %48 = dma.hbm_to_vmem [thread:$0]  %s2744_s2, 512, %s43_s15, [#allocation6], %s2397_s27, %s2397_s27, %s2398_s28  }
  0x35   :  { %s2343_s5 = scalar_lea.hbm %s2745_s3, 512 }
  0x36   :  { %p2344_p10 = scmp.ne.s32.totalorder %s2745_s3, %s2343_s5  ;;  %p2347_p11 = scmp.lt.u32.totalorder %s2343_s5, %s2745_s3 }
  0x38   :  { %p2349_p12 = pnand %p2347_p11, %p2344_p10 }
  0x3a   :  { %2352 = shalt.err (!%p2349_p12)
}
  0x3b   :  { %s2353_s10 = scalar_lea.vmem %s2476_s17, 512  ;;  %p2358_p0 = scmp.lt.s32.totalorder %s2476_s17, %s2476_s17 }
  0x3c   :  { %p2354_p13 = scmp.ne.s32.totalorder %s2476_s17, %s2353_s10  ;;  %p2359_p1 = scmp.lt.s32.totalorder %s2353_s10, %s2353_s10 }
  0x3e   :  { %p2360_p2 = por %p2359_p1, %p2358_p0 }
  0x40   :  { %p2361_p3 = pnand %p2360_p2, %p2354_p13 }
  0x42   :  { %2364 = shalt.err (!%p2361_p3)
}
  0x43   :  { %60 = dma.hbm_to_vmem [thread:$0]  %s2745_s3, 512, %s2476_s17, [#allocation9], %s2397_s27, %s2397_s27, %s2398_s28  }
  0x44   :  { %2387 = dma.done.wait [#allocation3], 256  }
  0x45   :  { %2388 = vsyncadd [#allocation3], 4294967040 }
  0x46   :  { %2389 = dma.done.wait [#allocation6], 1024  }
  0x47   :  { %2390 = vsyncadd [#allocation6], 4294966272 }
  0x48   :  { %2391 = dma.done.wait [#allocation9], 512  }
  0x49   :  { %2392 = vsyncadd [#allocation9], 4294966784  ;;  %v2513_v0 = vld [vmem:[#allocation2] sm:$0xff]  ;;  %vm81_vm0 = vcmask 261120   ;;  %v2515_v1 = vld [vmem:[#allocation2 + $0x8] sm:$0xff]  ;;  %s2401_s3 = smov 96  }
  0x4a   :  { %v97_v2 = vld [vmem:[#allocation7] sm:$0xff]  ;;  %v79_v3 = vmul.f32 %v2513_v0, %v2513_v0  ;;  %v80_v4 = vmul.f32 %v2515_v1, %v2515_v1  ;;  %v98_v5 = vld [vmem:[#allocation7 + $0x8] sm:$0xff]  ;;  %v99_v6 = vld [vmem:[#allocation7 + $0x10] sm:$0xff]  ;;  %v2402_v34 = vmov 0.0|0.0   ;;  %vm2403_vm1 = vmmov 0   ;;  %s2405_s12 = smov 120  }
  0x4b   :  { %v100_v7 = vld [vmem:[#allocation7 + $0x18] sm:$0xff]  ;;  %v2161_v8 = vpack.i.bf16 %v98_v5, %v97_v2  ;;  %v75_v12 = vld [vmem:[#allocation5] sm:$0xff]  ;;  %v2062_v13 = vpack.c.bf16 %v98_v5, %v97_v2  ;;  %v76_v23 = vld [vmem:[#allocation5 + $0x8] sm:$0xff]  ;;  %v2404_v35 = vmov 0.0   ;;  %vm295_vm2 = vcmask 64512   ;;  %s2406_s1 = smov 88  }
  0x4c   :  { %v82_v9 = vsel %vm81_vm0, %v79_v3, 0.0  ;;  %v2166_v10 = vpack.i.bf16 %v100_v7, %v99_v6  ;;  %v85_v11 = vsel %vm81_vm0, %v80_v4, 0.0  ;;  %1933 = vmatprep.mubr.msk.f32.mxu1 %vm81_vm0, %v75_v12  ;;  %v2066_v14 = vpack.c.bf16 %v100_v7, %v99_v6  ;;  %vm2537_vm3 = vmpackc.low %vm295_vm2, %vm295_vm2  ;;  %s2407_s13 = smov 112   ;;  %v77_v63 = vld [vmem:[#allocation5 + $0x10] sm:$0xff]  ;;  %v78_v2 = vld [vmem:[#allocation5 + $0x18] sm:$0xff]  ;;  %s2408_s14 = smov 104  }
  0x4d   :  { %83 = vadd.xlane.f32.xlu0 %v82_v9  ;;  %2162 = vrot.lane.b32.xlu1 %v2161_v8, %s2401_s3  ;;  %vm375_vm4 = vcmask 130048   ;;  %s2409_s15 = smov 80   ;;  %s2410_s16 = smov 72   ;;  %vm996_vm5 = vcmask 195584  }
  0x4e   :  { %2063 = vmatprep.subr.bf16.mxu0 %v2062_v13  ;;  %s2411_s17 = smov 16   ;;  %s2412_s19 = smov 24  }
  0x4f   :  { %2065 = vmatpush3.bf16.msra.mxu0 %v2062_v13  ;;  %s2413_s20 = smov [#allocation10]  }
  0x50   :  { %2067 = vmatprep.subr.bf16.mxu0 %v2066_v14  ;;  %s1792_s21 = sshll.u32 %s2413_s20, 4  ;;  %s1793_s21 = int_to_ptr.vmem [resolvable:$true] %s1792_s21 }
  0x51   :  { %86 = vadd.xlane.f32.xlu0 %v85_v11  ;;  %2167 = vrot.lane.b32.xlu1 %v2166_v10, %s2401_s3  ;;  %s2365_s22 = scalar_lea.vmem %s1793_s21, 256  ;;  %p2370_p5 = scmp.lt.s32.totalorder %s1793_s21, %s1793_s21 }
  0x52   :  { %p2366_p4 = scmp.ne.s32.totalorder %s1793_s21, %s2365_s22  ;;  %p2371_p6 = scmp.lt.s32.totalorder %s2365_s22, %s2365_s22 }
  0x53   :  { %2069 = vmatpush3.bf16.msra.mxu0 %v2066_v14 }
  0x54   :  { %2078 = vmatprep.subr.bf16.mxu0 %v2402_v34  ;;  %p2372_p7 = por %p2371_p6, %p2370_p5 }
  0x56   :  { %p2373_p8 = pnand %p2372_p7, %p2366_p4 }
  0xbf   :  { %v2163_v15 = vpop.permute.xlu1 %2162 }
  0xc0   :  { %v2165_v16 = vunpack.i.h.bf16 %v2163_v15  ;;  %v2164_v17 = vunpack.i.l.bf16 %v2163_v15 }
  0xc2   :  { %v2070_v18 = vpack.c.bf16 %v2165_v16, %v2164_v17 }
  0xc3   :  { %v2168_v19 = vpop.permute.xlu1 %2167 }
  0xc4   :  { %v2170_v20 = vunpack.i.h.bf16 %v2168_v19  ;;  %v2169_v21 = vunpack.i.l.bf16 %v2168_v19  ;;  %2071 = vmatprep.subr.bf16.mxu1 %v2070_v18 }
  0xc5   :  { %2073 = vmatpush3.bf16.msra.mxu1 %v2070_v18 }
  0xc6   :  { %v2074_v22 = vpack.c.bf16 %v2170_v20, %v2169_v21 }
  0xc8   :  { %2075 = vmatprep.subr.bf16.mxu1 %v2074_v22 }
  0xc9   :  { %2077 = vmatpush3.bf16.msra.mxu1 %v2074_v22 }
  0xca   :  { %2082 = vmatprep.subr.bf16.mxu1 %v2402_v34 }
  0xcc   :  { %1934 = vmatmul.mubr.msk.f32.vlgmr.msra.gmra.mrb[0].mxu1 %vm81_vm0, %v76_v23 }
  0xcd   :  { %1936 = vmatprep.mubr.msk.f32.mxu1 %vm81_vm0, %v77_v63 }
  0xd0   :  { %1937 = vmatmul.mubr.msk.f32.gmra.mrb[2].mxu1 %vm81_vm0, %v78_v2 }
  0xd1   :  { %1950 = vmatprep.mubr.msk.f32.mxu1 %vm2403_vm1, %v2404_v35 }
  0xda   :  { %v84_v24 = vpop.xlane.xlu0 %83 }
  0xdb   :  { %v89_v25 = vmul.f32 0.03125, %v84_v24 }
  0xdd   :  { %v91_v26 = vadd.f32 1e-06, %v89_v25 }
  0xde   :  { %v87_v27 = vpop.xlane.xlu0 %86 }
  0xdf   :  { %2241 = vrsqrt.f32 %v91_v26  ;;  %v90_v28 = vmul.f32 0.03125, %v87_v27 }
  0xe1   :  { %v92_v29 = vadd.f32 1e-06, %v90_v28 }
  0xe3   :  { %2243 = vrsqrt.f32 %v92_v29 }
  0xe9   :  { %v2242_v30 = vpop.eup %2241 }
  0xea   :  { %v95_v31 = vmul.f32 %v2242_v30, %v2513_v0 }
  0xec   :  { %1922 = vmatprep.mubr.msk.f32.mxu0 %vm81_vm0, %v95_v31 }
  0xed   :  { %v2244_v32 = vpop.eup %2243 }
  0xee   :  { %v96_v33 = vmul.f32 %v2244_v32, %v2515_v1 }
  0xf0   :  { %1923 = vmatmul.mubr.msk.f32.vlgmr.msra.gmra.mrb[0].mxu0 %vm81_vm0, %v96_v33 }
  0xf1   :  { %1943 = vmatprep.mubr.msk.f32.mxu0 %vm2403_vm1, %v2404_v35 }
 0x19f   :  { %v1935_v36 = vpop.f32.mrb[0].mxu1 }
 0x1a0   :  { %v276_v37 = vpop.f32.mrb[1].mxu1 }
 0x1a1   :  { %v2541_v39 = vpack.i.bf16 %v1935_v36, %v276_v37  ;;  %v2079_v40 = vpack.c.bf16 %v1935_v36, %v276_v37 }
 0x1a3   :  { %2172 = vrot.lane.b32.xlu0 %v2541_v39, %s2405_s12  ;;  %2081 = vmatpush3.bf16.xpose.msk.msra.mxu0 %vm2537_vm3, %v2079_v40  ;;  %v2585_v15 = vpop.f32.mrb[2].mxu1 }
 0x1a4   :  { %2085 = vmatprep.subr.bf16.mxu0 %v2402_v34  ;;  %v2587_v16 = vpop.f32.mrb[3].mxu1 }
 0x1a5   :  { %v2600_v25 = vpack.i.bf16 %v2585_v15, %v2587_v16  ;;  %v2107_v26 = vpack.c.bf16 %v2585_v15, %v2587_v16 }
 0x1c3   :  { %v2548_v41 = vpop.f32.mrb[0].mxu0 }
 0x1c4   :  { %v2550_v42 = vpop.f32.mrb[1].mxu0 }
 0x1c5   :  { %466 = vrot.lane.b32.xlu1 %v2550_v42, %s2405_s12  ;;  %1944 = vmatmul.mubr.msk.f32.vlgmr.msra.gmra.mrb[2].mxu0 %vm295_vm2, %v2550_v42 }
 0x1c6   :  { %1957 = vmatprep.mubr.msk.f32.mxu0 %vm2403_vm1, %v2404_v35 }
 0x215   :  { %v2173_v43 = vpop.permute.xlu0 %2172 }
 0x216   :  { %v2175_v44 = vunpack.i.h.bf16 %v2173_v43  ;;  %v2174_v45 = vunpack.i.l.bf16 %v2173_v43 }
 0x218   :  { %v2086_v46 = vpack.c.bf16 %v2175_v44, %v2174_v45 }
 0x21a   :  { %2088 = vmatpush3.bf16.xpose.msk.msra.mxu0 %vm2537_vm3, %v2086_v46 }
 0x21b   :  { %2096 = vmatprep.subr.bf16.mxu0 %v2402_v34 }
 0x237   :  { %v467_v47 = vpop.permute.xlu1 %466 }
 0x238   :  { %1958 = vmatmul.mubr.msk.f32.vlgmr.msra.gmra.mrb[4].mxu0 %vm295_vm2, %v467_v47 }
 0x239   :  { %1978 = vmatprep.mubr.msk.f32.mxu0 %vm2403_vm1, %v2404_v35 }
 0x298   :  { %v371_v48 = vpop.f32.mrb[2].mxu0 }
 0x299   :  { %v1945_v49 = vpop.f32.mrb[3].mxu0  ;;  %v376_v50 = vsel %vm375_vm4, %v371_v48, -inf }
 0x29a   :  { %377 = vmax.xlane.f32.xlu1 %v376_v50 }
 0x2ab   :  { %2177 = vrot.lane.b32.xlu1 %v2541_v39, %s2401_s3 }
 0x30b   :  { %v544_v51 = vpop.f32.mrb[4].mxu0 }
 0x30c   :  { %v1959_v52 = vpop.f32.mrb[5].mxu0  ;;  %v548_v53 = vsel %vm375_vm4, %v544_v51, -inf }
 0x30d   :  { %549 = vmax.xlane.f32.xlu0 %v548_v53 }
 0x323   :  { %2182 = vrot.lane.b32.xlu0 %v2541_v39, %s2406_s1 }
 0x327   :  { %v378_v54 = vpop.xlane.xlu1 %377 }
 0x328   :  { %v379_v55 = vsub.f32 %v371_v48, %v378_v54 }
 0x32a   :  { %v380_v56 = vmul.f32 1.442695, %v379_v55 }
 0x32b   :  { %v2178_v57 = vpop.permute.xlu1 %2177 }
 0x32c   :  { %2245 = vpow2.f32 %v380_v56  ;;  %v2180_v58 = vunpack.i.h.bf16 %v2178_v57  ;;  %v2179_v59 = vunpack.i.l.bf16 %v2178_v57 }
 0x32e   :  { %v2083_v60 = vpack.c.bf16 %v2180_v58, %v2179_v59 }
 0x330   :  { %2084 = vmatpush3.bf16.msra.mxu1 %v2083_v60 }
 0x331   :  { %2089 = vmatprep.subr.bf16.mxu1 %v2402_v34 }
 0x336   :  { %v2246_v61 = vpop.eup %2245 }
 0x337   :  { %v382_v62 = vsel %vm375_vm4, %v2246_v61, 0.0 }
 0x338   :  { %383 = vadd.xlane.f32.xlu1 %v382_v62 }
 0x349   :  { %2187 = vrot.lane.b32.xlu1 %v2541_v39, %s2407_s13 }
 0x39a   :  { %v550_v3 = vpop.xlane.xlu0 %549 }
 0x39b   :  { %v551_v4 = vsub.f32 %v544_v51, %v550_v3 }
 0x39d   :  { %v552_v5 = vmul.f32 1.442695, %v551_v4 }
 0x39e   :  { %v2183_v9 = vpop.permute.xlu0 %2182 }
 0x39f   :  { %2247 = vpow2.f32 %v552_v5  ;;  %v2185_v10 = vunpack.i.h.bf16 %v2183_v9  ;;  %v2184_v11 = vunpack.i.l.bf16 %v2183_v9 }
 0x3a1   :  { %v2090_v14 = vpack.c.bf16 %v2185_v10, %v2184_v11 }
 0x3a9   :  { %v2248_v6 = vpop.eup %2247 }
 0x3aa   :  { %v554_v7 = vsel %vm375_vm4, %v2248_v6, 0.0 }
 0x3ab   :  { %555 = vadd.xlane.f32.xlu1 %v554_v7 }
 0x3bc   :  { %638 = vrot.lane.b32.xlu1 %v2550_v42, %s2407_s13 }
 0x3c5   :  { %v384_v8 = vpop.xlane.xlu1 %383 }
 0x3c6   :  { %2249 = vrcp.f32 %v384_v8 }
 0x3c9   :  { %v2188_v17 = vpop.permute.xlu1 %2187 }
 0x3ca   :  { %v2190_v19 = vunpack.i.h.bf16 %v2188_v17  ;;  %v2189_v20 = vunpack.i.l.bf16 %v2188_v17 }
 0x3cc   :  { %v2093_v23 = vpack.c.bf16 %v2190_v19, %v2189_v20 }
 0x3d0   :  { %v2250_v12 = vpop.eup %2249 }
 0x3d1   :  { %v386_v13 = vmul.f32 %v2250_v12, %v2246_v61 }
 0x3d3   :  { %1951 = vmatmul.mubr.msk.f32.vlgmr.msra.gmra.mrb[4].mxu1 %vm375_vm4, %v386_v13 }
 0x3d4   :  { %2091 = vmatpush3.bf16.msra.mxu1 %v2090_v14  ;;  %1964 = vmatprep.mubr.msk.f32.mxu1 %vm2403_vm1, %v2404_v35 }
 0x3d5   :  { %2092 = vmatprep.subr.bf16.mxu1 %v2402_v34 }
 0x438   :  { %v556_v18 = vpop.xlane.xlu1 %555 }
 0x439   :  { %2251 = vrcp.f32 %v556_v18 }
 0x43c   :  { %v639_v24 = vpop.permute.xlu1 %638 }
 0x443   :  { %v2252_v21 = vpop.eup %2251 }
 0x444   :  { %v558_v22 = vmul.f32 %v2252_v21, %v2248_v6 }
 0x446   :  { %1965 = vmatmul.mubr.msk.f32.vlgmr.msra.gmra.mrb[6].mxu1 %vm375_vm4, %v558_v22 }
 0x447   :  { %2095 = vmatpush3.bf16.xpose.msk.msra.mxu1 %vm2537_vm3, %v2093_v23  ;;  %1971 = vmatprep.mubr.msk.f32.mxu1 %vm2403_vm1, %v2404_v35 }
 0x448   :  { %2103 = vmatprep.subr.bf16.mxu1 %v2402_v34 }
 0x44e   :  { %1972 = vmatmul.mubr.msk.f32.vlgmr.msra.gmra.mrb[8].mxu1 %vm295_vm2, %v639_v24 }
 0x44f   :  { %1992 = vmatprep.mubr.msk.f32.mxu1 %vm2403_vm1, %v2404_v35 }
 0x4a6   :  { %v2604_v27 = vpop.f32.mrb[4].mxu1 }
 0x4a7   :  { %v1952_v28 = vpop.f32.mrb[5].mxu1 }
 0x519   :  { %v2606_v29 = vpop.f32.mrb[6].mxu1 }
 0x51a   :  { %v1966_v30 = vpop.f32.mrb[7].mxu1 }
 0x521   :  { %v716_v31 = vpop.f32.mrb[8].mxu1 }
 0x522   :  { %v1973_v32 = vpop.f32.mrb[9].mxu1  ;;  %v720_v33 = vsel %vm375_vm4, %v716_v31, -inf }
 0x523   :  { %721 = vmax.xlane.f32.xlu1 %v720_v33 }
 0x534   :  { %2197 = vrot.lane.b32.xlu1 %v2541_v39, %s2408_s14 }
 0x538   :  { %810 = vrot.lane.b32.xlu1 %v2550_v42, %s2408_s14 }
 0x5b0   :  { %v722_v36 = vpop.xlane.xlu1 %721 }
 0x5b1   :  { %v723_v37 = vsub.f32 %v716_v31, %v722_v36 }
 0x5b3   :  { %v724_v40 = vmul.f32 1.442695, %v723_v37 }
 0x5b4   :  { %v2198_v50 = vpop.permute.xlu1 %2197 }
 0x5b5   :  { %2253 = vpow2.f32 %v724_v40  ;;  %v2200_v51 = vunpack.i.h.bf16 %v2198_v50  ;;  %v2199_v52 = vunpack.i.l.bf16 %v2198_v50 }
 0x5b7   :  { %v2100_v54 = vpack.c.bf16 %v2200_v51, %v2199_v52 }
 0x5b8   :  { %v811_v55 = vpop.permute.xlu1 %810 }
 0x5bf   :  { %v2254_v43 = vpop.eup %2253 }
 0x5c0   :  { %v726_v44 = vsel %vm375_vm4, %v2254_v43, 0.0 }
 0x5c1   :  { %727 = vadd.xlane.f32.xlu0 %v726_v44 }
 0x5d7   :  { %2192 = vrot.lane.b32.xlu0 %v2541_v39, %s2409_s15 }
 0x64e   :  { %v728_v45 = vpop.xlane.xlu0 %727 }
 0x64f   :  { %2255 = vrcp.f32 %v728_v45 }
 0x652   :  { %v2193_v46 = vpop.permute.xlu0 %2192 }
 0x653   :  { %v2195_v47 = vunpack.i.h.bf16 %v2193_v46  ;;  %v2194_v48 = vunpack.i.l.bf16 %v2193_v46 }
 0x655   :  { %v2097_v49 = vpack.c.bf16 %v2195_v47, %v2194_v48 }
 0x657   :  { %2098 = vmatpush3.bf16.msra.mxu0 %v2097_v49 }
 0x658   :  { %2099 = vmatprep.subr.bf16.mxu0 %v2402_v34 }
 0x659   :  { %v2256_v42 = vpop.eup %2255 }
 0x65a   :  { %v730_v53 = vmul.f32 %v2256_v42, %v2254_v43 }
 0x65c   :  { %1979 = vmatmul.mubr.msk.f32.vlgmr.msra.gmra.mrb[6].mxu0 %vm375_vm4, %v730_v53 }
 0x65d   :  { %1985 = vmatprep.mubr.msk.f32.mxu0 %vm2403_vm1, %v2404_v35 }
 0x660   :  { %2102 = vmatpush3.bf16.xpose.msk.msra.mxu0 %vm2537_vm3, %v2100_v54 }
 0x661   :  { %2110 = vmatprep.subr.bf16.mxu0 %v2402_v34 }
 0x667   :  { %1986 = vmatmul.mubr.msk.f32.vlgmr.msra.gmra.mrb[8].mxu0 %vm295_vm2, %v811_v55 }
 0x668   :  { %2006 = vmatprep.mubr.msk.f32.mxu0 %vm2403_vm1, %v2404_v35 }
 0x72f   :  { %v2626_v56 = vpop.f32.mrb[6].mxu0 }
 0x730   :  { %v1980_v57 = vpop.f32.mrb[7].mxu0 }
 0x73a   :  { %v888_v58 = vpop.f32.mrb[8].mxu0 }
 0x73b   :  { %v1987_v59 = vpop.f32.mrb[9].mxu0  ;;  %v892_v60 = vsel %vm375_vm4, %v888_v58, -inf }
 0x73c   :  { %893 = vmax.xlane.f32.xlu0 %v892_v60 }
 0x752   :  { %2202 = vrot.lane.b32.xlu0 %v2541_v39, %s2410_s16 }
 0x756   :  { %2212 = vrot.lane.b32.xlu0 %v2600_v25, %s2405_s12 }
 0x75a   :  { %1167 = vrot.lane.b32.xlu0 %v2548_v41, %s2405_s12 }
 0x7c9   :  { %v894_v61 = vpop.xlane.xlu0 %893 }
 0x7ca   :  { %v895_v62 = vsub.f32 %v888_v58, %v894_v61 }
 0x7cc   :  { %v896_v63 = vmul.f32 1.442695, %v895_v62 }
 0x7cd   :  { %v2203_v2 = vpop.permute.xlu0 %2202 }
 0x7ce   :  { %2257 = vpow2.f32 %v896_v63  ;;  %v2205_v3 = vunpack.i.h.bf16 %v2203_v2  ;;  %v2204_v4 = vunpack.i.l.bf16 %v2203_v2 }
 0x7d0   :  { %v2104_v5 = vpack.c.bf16 %v2205_v3, %v2204_v4 }
 0x7d2   :  { %2105 = vmatpush3.bf16.msra.mxu1 %v2104_v5 }
 0x7d3   :  { %2106 = vmatprep.subr.bf16.mxu1 %v2402_v34 }
 0x7d8   :  { %v2258_v6 = vpop.eup %2257 }
 0x7d9   :  { %v898_v39 = vsel %vm375_vm4, %v2258_v6, 0.0 }
 0x7da   :  { %899 = vadd.xlane.f32.xlu1 %v898_v39 }
 0x867   :  { %v900_v7 = vpop.xlane.xlu1 %899 }
 0x868   :  { %2259 = vrcp.f32 %v900_v7 }
 0x872   :  { %v2260_v8 = vpop.eup %2259 }
 0x873   :  { %v902_v9 = vmul.f32 %v2260_v8, %v2258_v6 }
 0x875   :  { %1993 = vmatmul.mubr.msk.f32.vlgmr.msra.gmra.mrb[10].mxu1 %vm375_vm4, %v902_v9 }
 0x876   :  { %2109 = vmatpush3.bf16.xpose.msk.msra.mxu1 %vm2537_vm3, %v2107_v26  ;;  %1999 = vmatprep.mubr.msk.f32.mxu1 %vm2403_vm1, %v2404_v35  ;;  %v2213_v26 = vpop.permute.xlu0 %2212 }
 0x877   :  { %2117 = vmatprep.subr.bf16.mxu1 %v2402_v34  ;;  %v2215_v30 = vunpack.i.h.bf16 %v2213_v26  ;;  %v2214_v31 = vunpack.i.l.bf16 %v2213_v26 }
 0x879   :  { %v2114_v33 = vpack.c.bf16 %v2215_v30, %v2214_v31 }
 0x87a   :  { %v1168_v36 = vpop.permute.xlu0 %1167 }
 0x87d   :  { %2000 = vmatmul.mubr.msk.f32.vlgmr.msra.gmra.mrb[12].mxu1 %vm295_vm2, %v2548_v41 }
 0x87e   :  { %2020 = vmatprep.mubr.msk.f32.mxu1 %vm2403_vm1, %v2404_v35 }
 0x948   :  { %v2650_v10 = vpop.f32.mrb[10].mxu1 }
 0x949   :  { %v1994_v11 = vpop.f32.mrb[11].mxu1 }
 0x950   :  { %v1073_v12 = vpop.f32.mrb[12].mxu1 }
 0x951   :  { %v2001_v13 = vpop.f32.mrb[13].mxu1  ;;  %v1077_v14 = vsel %vm375_vm4, %v1073_v12, -inf }
 0x952   :  { %1078 = vmax.xlane.f32.xlu1 %v1077_v14 }
 0x9df   :  { %v1079_v15 = vpop.xlane.xlu1 %1078 }
 0x9e0   :  { %v1080_v16 = vsub.f32 %v1073_v12, %v1079_v15 }
 0x9e2   :  { %v1081_v17 = vmul.f32 1.442695, %v1080_v16 }
 0x9e4   :  { %2261 = vpow2.f32 %v1081_v17 }
 0x9ee   :  { %v2262_v18 = vpop.eup %2261 }
 0x9ef   :  { %v1083_v19 = vsel %vm375_vm4, %v2262_v18, 0.0 }
 0x9f0   :  { %1084 = vadd.xlane.f32.xlu1 %v1083_v19 }
 0xa01   :  { %2207 = vrot.lane.b32.xlu1 %v2600_v25, %s2401_s3 }
 0xa7d   :  { %v1085_v20 = vpop.xlane.xlu1 %1084 }
 0xa7e   :  { %2263 = vrcp.f32 %v1085_v20 }
 0xa81   :  { %v2208_v21 = vpop.permute.xlu1 %2207 }
 0xa82   :  { %v2210_v22 = vunpack.i.h.bf16 %v2208_v21  ;;  %v2209_v23 = vunpack.i.l.bf16 %v2208_v21 }
 0xa84   :  { %v2111_v24 = vpack.c.bf16 %v2210_v22, %v2209_v23 }
 0xa86   :  { %2112 = vmatpush3.bf16.msra.mxu0 %v2111_v24 }
 0xa87   :  { %2113 = vmatprep.subr.bf16.mxu0 %v2402_v34 }
 0xa88   :  { %v2264_v28 = vpop.eup %2263 }
 0xa89   :  { %v1087_v32 = vmul.f32 %v2264_v28, %v2262_v18 }
 0xa8b   :  { %2007 = vmatmul.mubr.msk.f32.vlgmr.msra.gmra.mrb[10].mxu0 %vm375_vm4, %v1087_v32 }
 0xa8c   :  { %2013 = vmatprep.mubr.msk.f32.mxu0 %vm2403_vm1, %v2404_v35 }
 0xa8f   :  { %2116 = vmatpush3.bf16.xpose.msk.msra.mxu0 %vm2537_vm3, %v2114_v33 }
 0xa90   :  { %2124 = vmatprep.subr.bf16.mxu0 %v2402_v34 }
 0xa96   :  { %2014 = vmatmul.mubr.msk.f32.vlgmr.msra.gmra.mrb[12].mxu0 %vm295_vm2, %v1168_v36 }
 0xa97   :  { %2034 = vmatprep.mubr.msk.f32.mxu0 %vm2403_vm1, %v2404_v35 }
 0xb5e   :  { %v2666_v37 = vpop.f32.mrb[10].mxu0 }
 0xb5f   :  { %v2008_v40 = vpop.f32.mrb[11].mxu0 }
 0xb69   :  { %v1245_v43 = vpop.f32.mrb[12].mxu0 }
 0xb6a   :  { %v2015_v44 = vpop.f32.mrb[13].mxu0  ;;  %v1249_v45 = vsel %vm375_vm4, %v1245_v43, -inf }
 0xb6b   :  { %1250 = vmax.xlane.f32.xlu0 %v1249_v45 }
 0xb81   :  { %2217 = vrot.lane.b32.xlu0 %v2600_v25, %s2406_s1 }
 0xb85   :  { %1339 = vrot.lane.b32.xlu0 %v2548_v41, %s2407_s13 }
 0xbf8   :  { %v1251_v46 = vpop.xlane.xlu0 %1250 }
 0xbf9   :  { %v1252_v47 = vsub.f32 %v1245_v43, %v1251_v46 }
 0xbfb   :  { %v1253_v48 = vmul.f32 1.442695, %v1252_v47 }
 0xbfc   :  { %v2218_v49 = vpop.permute.xlu0 %2217 }
 0xbfd   :  { %2265 = vpow2.f32 %v1253_v48  ;;  %v2220_v50 = vunpack.i.h.bf16 %v2218_v49  ;;  %v2219_v42 = vunpack.i.l.bf16 %v2218_v49  ;;  %v1698_v48 = vld [vmem:[#allocation8] sm:$0xff]  ;;  %v1699_v49 = vld [vmem:[#allocation8 + $0x8] sm:$0xff] }
 0xbff   :  { %v2118_v51 = vpack.c.bf16 %v2220_v50, %v2219_v42  ;;  %v1700_v50 = vld [vmem:[#allocation8 + $0x10] sm:$0xff]  ;;  %v2134_v42 = vpack.c.bf16 %v1699_v49, %v1698_v48 }
 0xc00   :  { %v1340_v62 = vpop.permute.xlu0 %1339 }
 0xc01   :  { %2119 = vmatpush3.bf16.msra.mxu1 %v2118_v51  ;;  %v1701_v51 = vld [vmem:[#allocation8 + $0x18] sm:$0xff] }
 0xc02   :  { %2120 = vmatprep.subr.bf16.mxu1 %v2402_v34 }
 0xc07   :  { %v2266_v52 = vpop.eup %2265 }
 0xc08   :  { %v1255_v53 = vsel %vm375_vm4, %v2266_v52, 0.0 }
 0xc09   :  { %1256 = vadd.xlane.f32.xlu1 %v1255_v53 }
 0xc1a   :  { %2222 = vrot.lane.b32.xlu1 %v2600_v25, %s2407_s13 }
 0xc96   :  { %v1257_v54 = vpop.xlane.xlu1 %1256 }
 0xc97   :  { %2267 = vrcp.f32 %v1257_v54 }
 0xc9a   :  { %v2223_v55 = vpop.permute.xlu1 %2222 }
 0xc9b   :  { %v2225_v57 = vunpack.i.h.bf16 %v2223_v55  ;;  %v2224_v58 = vunpack.i.l.bf16 %v2223_v55 }
 0xc9d   :  { %v2121_v61 = vpack.c.bf16 %v2225_v57, %v2224_v58 }
 0xca1   :  { %v2268_v59 = vpop.eup %2267 }
 0xca2   :  { %v1259_v60 = vmul.f32 %v2268_v59, %v2266_v52  ;;  %v2138_v52 = vpack.c.bf16 %v1701_v51, %v1700_v50 }
 0xca4   :  { %2021 = vmatmul.mubr.msk.f32.vlgmr.msra.gmra.mrb[14].mxu1 %vm375_vm4, %v1259_v60 }
 0xca5   :  { %2123 = vmatpush3.bf16.xpose.msk.msra.mxu1 %vm2537_vm3, %v2121_v61  ;;  %2027 = vmatprep.mubr.msk.f32.mxu1 %vm2403_vm1, %v2404_v35 }
 0xca6   :  { %2131 = vmatprep.subr.bf16.mxu1 %v2402_v34 }
 0xcac   :  { %2028 = vmatmul.mubr.msk.f32.vlgmr.msra.gmra.mrb[16].mxu1 %vm295_vm2, %v1340_v62 }
 0xcad   :  { %2048 = vmatprep.mubr.msk.f32.mxu1 %vm2403_vm1, %v2404_v35 }
 0xd77   :  { %v1335_v63 = vpop.f32.mrb[14].mxu1 }
 0xd78   :  { %v2022_v2 = vpop.f32.mrb[15].mxu1 }
 0xd7f   :  { %v1417_v3 = vpop.f32.mrb[16].mxu1 }
 0xd80   :  { %v2029_v4 = vpop.f32.mrb[17].mxu1  ;;  %v1421_v5 = vsel %vm375_vm4, %v1417_v3, -inf }
 0xd81   :  { %1422 = vmax.xlane.f32.xlu1 %v1421_v5 }
 0xd92   :  { %2232 = vrot.lane.b32.xlu1 %v2600_v25, %s2408_s14 }
 0xd96   :  { %1511 = vrot.lane.b32.xlu1 %v2548_v41, %s2408_s14 }
 0xe0e   :  { %v1423_v6 = vpop.xlane.xlu1 %1422 }
 0xe0f   :  { %v1424_v39 = vsub.f32 %v1417_v3, %v1423_v6 }
 0xe11   :  { %v1425_v7 = vmul.f32 1.442695, %v1424_v39 }
 0xe12   :  { %v2233_v16 = vpop.permute.xlu1 %2232 }
 0xe13   :  { %2269 = vpow2.f32 %v1425_v7  ;;  %v2235_v17 = vunpack.i.h.bf16 %v2233_v16  ;;  %v2234_v18 = vunpack.i.l.bf16 %v2233_v16 }
 0xe15   :  { %v2128_v20 = vpack.c.bf16 %v2235_v17, %v2234_v18 }
 0xe16   :  { %v1512_v21 = vpop.permute.xlu1 %1511 }
 0xe1d   :  { %v2270_v8 = vpop.eup %2269 }
 0xe1e   :  { %v1427_v9 = vsel %vm375_vm4, %v2270_v8, 0.0 }
 0xe1f   :  { %1428 = vadd.xlane.f32.xlu0 %v1427_v9 }
 0xe35   :  { %2227 = vrot.lane.b32.xlu0 %v2600_v25, %s2409_s15 }
 0xeac   :  { %v1429_v11 = vpop.xlane.xlu0 %1428 }
 0xead   :  { %2271 = vrcp.f32 %v1429_v11 }
 0xeb0   :  { %v2228_v12 = vpop.permute.xlu0 %2227 }
 0xeb1   :  { %v2230_v13 = vunpack.i.h.bf16 %v2228_v12  ;;  %v2229_v14 = vunpack.i.l.bf16 %v2228_v12 }
 0xeb3   :  { %v2125_v15 = vpack.c.bf16 %v2230_v13, %v2229_v14 }
 0xeb5   :  { %2126 = vmatpush3.bf16.msra.mxu0 %v2125_v15 }
 0xeb6   :  { %2127 = vmatprep.subr.bf16.mxu0 %v2402_v34 }
 0xeb7   :  { %v2272_v41 = vpop.eup %2271 }
 0xeb8   :  { %v1431_v19 = vmul.f32 %v2272_v41, %v2270_v8 }
 0xeba   :  { %2035 = vmatmul.mubr.msk.f32.vlgmr.msra.gmra.mrb[14].mxu0 %vm375_vm4, %v1431_v19 }
 0xebb   :  { %2041 = vmatprep.mubr.msk.f32.mxu0 %vm2403_vm1, %v2404_v35 }
 0xebe   :  { %2130 = vmatpush3.bf16.xpose.msk.msra.mxu0 %vm2537_vm3, %v2128_v20 }
 0xec5   :  { %2042 = vmatmul.mubr.msk.f32.vlgmr.msra.gmra.mrb[16].mxu0 %vm295_vm2, %v1512_v21 }
 0xf8d   :  { %v1507_v22 = vpop.f32.mrb[14].mxu0 }
 0xf8e   :  { %v2036_v23 = vpop.f32.mrb[15].mxu0 }
 0xf98   :  { %v1589_v24 = vpop.f32.mrb[16].mxu0 }
 0xf99   :  { %v2043_v34 = vpop.f32.mrb[17].mxu0  ;;  %v1593_v26 = vsel %vm375_vm4, %v1589_v24, -inf }
 0xf9a   :  { %1594 = vmax.xlane.f32.xlu0 %v1593_v26 }
 0xfb0   :  { %2237 = vrot.lane.b32.xlu0 %v2600_v25, %s2410_s16 }
 0xfb4   :  { %987 = vrot.lane.b32.xlu0 %v2626_v56, %s2411_s17 }
 0xfb8   :  { %991 = vrot.lane.b32.xlu0 %v2650_v10, %s2412_s19 }
0x1027   :  { %v1595_v35 = vpop.xlane.xlu0 %1594 }
0x1028   :  { %v1596_v38 = vsub.f32 %v1589_v24, %v1595_v35 }
0x102a   :  { %v1597_v28 = vmul.f32 1.442695, %v1596_v38 }
0x102b   :  { %v2238_v30 = vpop.permute.xlu0 %2237 }
0x102c   :  { %2273 = vpow2.f32 %v1597_v28  ;;  %v2240_v31 = vunpack.i.h.bf16 %v2238_v30  ;;  %v2239_v32 = vunpack.i.l.bf16 %v2238_v30 }
0x102e   :  { %v2132_v33 = vpack.c.bf16 %v2240_v31, %v2239_v32 }
0x102f   :  { %v988_v10 = vpop.permute.xlu0 %987 }
0x1030   :  { %2133 = vmatpush3.bf16.msra.mxu1 %v2132_v33 }
0x1031   :  { %2135 = vmatprep.subr.bf16.mxu1 %v2134_v42 }
0x1033   :  { %v992_v47 = vpop.permute.xlu0 %991 }
0x1036   :  { %v2274_v36 = vpop.eup %2273 }
0x1037   :  { %v1599_v40 = vsel %vm375_vm4, %v2274_v36, 0.0 }
0x1038   :  { %1600 = vadd.xlane.f32.xlu1 %v1599_v40 }
0x1049   :  { %983 = vrot.lane.b32.xlu1 %v2606_v29, %s2398_s28 }
0x104d   :  { %1684 = vrot.lane.b32.xlu1 %v1335_v63, %s2398_s28 }
0x1051   :  { %1688 = vrot.lane.b32.xlu1 %v1507_v22, %s2411_s17 }
0x10c5   :  { %v1601_v25 = vpop.xlane.xlu1 %1600 }
0x10c6   :  { %2275 = vrcp.f32 %v1601_v25 }
0x10c9   :  { %v984_v56 = vpop.permute.xlu1 %983 }
0x10ca   :  { %v994_v43 = vsel %vm295_vm2, %v2604_v27, %v984_v56 }
0x10cb   :  { %v995_v45 = vsel %vm375_vm4, %v994_v43, %v988_v10 }
0x10cc   :  { %v997_v29 = vsel %vm996_vm5, %v995_v45, %v992_v47 }
0x10cd   :  { %v1685_v54 = vpop.permute.xlu1 %1684 }
0x10ce   :  { %v1695_v57 = vsel %vm295_vm2, %v2666_v37, %v1685_v54 }
0x10d0   :  { %v2276_v44 = vpop.eup %2275 }
0x10d1   :  { %v1603_v46 = vmul.f32 %v2276_v44, %v2274_v36  ;;  %v1689_v55 = vpop.permute.xlu1 %1688 }
0x10d2   :  { %v1696_v58 = vsel %vm375_vm4, %v1695_v57, %v1689_v55 }
0x10d3   :  { %2049 = vmatmul.mubr.msk.f32.vlgmr.msra.gmra.mrb[18].mxu1 %vm375_vm4, %v1603_v46 }
0x10d4   :  { %2059 = vmatprep.mubr.msk.f32.mxu1 %vm81_vm0, %v997_v29  ;;  %2137 = vmatpush3.bf16.msra.mxu1 %v2134_v42 }
0x10d5   :  { %2139 = vmatprep.subr.bf16.mxu1 %v2138_v52 }
0x10d8   :  { %2141 = vmatpush3.bf16.msra.mxu1 %v2138_v52 }
0x11a6   :  { %v1679_v27 = vpop.f32.mrb[18].mxu1 }
0x11a7   :  { %1692 = vrot.lane.b32.xlu0 %v1679_v27, %s2412_s19  ;;  %v2050_v53 = vpop.f32.mrb[19].mxu1 }
0x1219   :  { %v1693_v59 = vpop.permute.xlu0 %1692 }
0x121a   :  { %v1697_v60 = vsel %vm996_vm5, %v1696_v58, %v1693_v59 }
0x121b   :  { %2060 = vmatmul.mubr.msk.f32.vlgmr.msra.gmra.mrb[20].mxu1 %vm81_vm0, %v1697_v60 }
0x12ee   :  { %v2061_v61 = vpop.f32.mrb[20].mxu1 }
0x12ef   :  { %v1784_v62 = vadd.f32 %v2061_v61, %v2515_v1  ;;  %v1774_v63 = vpop.f32.mrb[21].mxu1 }
0x12f0   :  { %v1783_v2 = vadd.f32 %v1774_v63, %v2513_v0 }
0x12f1   :  { %1786 = vst.msk [vmem:[#allocation10 + $0x8] sm:$0xff] %vm81_vm0, %v1784_v62 }
0x12f2   :  { %1785 = vst.msk [vmem:[#allocation10] sm:$0xff] %vm81_vm0, %v1783_v2 }
0x12f3   :  { %2376 = shalt.err (!%p2373_p8)
}
0x12f4   :  { %s2377_s25 = scalar_lea.hbm %s2746_s4, 256 }
0x12f5   :  { %p2378_p9 = scmp.ne.s32.totalorder %s2746_s4, %s2377_s25  ;;  %p2381_p10 = scmp.lt.u32.totalorder %s2377_s25, %s2746_s4 }
0x12f7   :  { %p2383_p11 = pnand %p2381_p10, %p2378_p9 }
0x12f9   :  { %2386 = shalt.err (!%p2383_p11)
}
0x12fa   :  { %1798 = dma.vmem_to_hbm [thread:$0]  %s1793_s21, 256, %s2746_s4, [#allocation4], %s2397_s27, %s2397_s27, %s2398_s28  }
0x12fb   :  { %2393 = dma.done.wait [#allocation4], 256  }
0x12fc   :  { %2394 = vsyncadd [#allocation4], 4294967040 }
0x12fd   :  { %1802 = vsyncpa [#allocation3], 1 }
0x12fe   :  { %1803 = vsyncpa [#allocation6], 1 }
0x12ff   :  { %1804 = vsyncpa [#allocation9], 1 }
0x1300   :  { %1805 = vsyncpa [#allocation4], 1 }

</bundles_post_ra>
